<compile_context>
chip_gen: v7x
topology: tpu7x:2x2x1
jax: 0.10.0
libtpu: 0.0.40
codegen_flags: <defaults>
</compile_context>

<pallas_src>
import math
import functools

import jax
import jax.numpy as jnp
from jax import lax
from jax.experimental import pallas as pl
from jax.experimental.pallas import tpu as pltpu


# ----------------------------------------------------------------------------
# Helpers
# ----------------------------------------------------------------------------
def _resident_spec(shape):
    """BlockSpec for a block whose index_map is constant across the grid.
    Single-buffered (no pointless double-buffer) when the installed Pallas
    supports pipeline_mode; falls back to a plain spec otherwise."""
    index_map = lambda *args: (0,) * len(shape)
    try:
        return pl.BlockSpec(shape, index_map, pipeline_mode=pl.Buffered(1))
    except Exception:
        return pl.BlockSpec(shape, index_map)


def _is_v5e():
    try:
        kind = jax.devices()[0].device_kind.lower()
        return ("v5 lite" in kind) or ("v5e" in kind) or ("v5litepod" in kind)
    except Exception:
        return False


# ----------------------------------------------------------------------------
# Path A: one-hot @ table on the MXU (small, VMEM-resident vocab)
# ----------------------------------------------------------------------------
def _onehot_kernel(ids_ref, iota_ref, w_ref, o_ref, *, v_tile, n_vtiles, scale):
    # ids_ref:  (TM, 1)  int32 -- this tile's token ids (per-step DMA, pipelined)
    # iota_ref: (1, Vp)  int32 -- resident vocab iota row (single-buffered)
    # w_ref:    (Vp, D)        -- resident embedding table (single-buffered)
    # o_ref:    (TM, D)  f32
    ids = ids_ref[...]                                   # (TM, 1)
    tile_m = ids.shape[0]
    d_model = w_ref.shape[1]
    precision = lax.Precision.HIGHEST if w_ref.dtype == jnp.float32 else None

    acc = jnp.zeros((tile_m, d_model), jnp.float32)
    # Static vocab-tile loop: keeps the compare/one-hot working set small
    # (VALU + vreg pressure) while the full table stays VMEM-resident.
    for v in range(n_vtiles):
        off = v * v_tile                                 # static offset
        onehot = (ids == iota_ref[:, off:off + v_tile]).astype(w_ref.dtype)
        acc = acc + jnp.dot(
            onehot,
            w_ref[off:off + v_tile, :],
            preferred_element_type=jnp.float32,
            precision=precision,
        )
    o_ref[...] = (acc * scale).astype(o_ref.dtype)


def _token_embedding_onehot(ids_flat, weights, *, scale, tile_m=256):
    n = ids_flat.shape[0]
    vocab, d_model = weights.shape

    # Vocab tiling: single tile for tiny vocabs, 512-wide tiles otherwise.
    if vocab <= 512:
        v_tile = max(128, pl.cdiv(vocab, 128) * 128)
    else:
        v_tile = 512
    v_pad = pl.cdiv(vocab, v_tile) * v_tile
    n_vtiles = v_pad // v_tile

    w = weights
    if v_pad != vocab:
        w = jnp.pad(w, ((0, v_pad - vocab), (0, 0)))     # zero rows, never selected
    iota = jnp.arange(v_pad, dtype=jnp.int32).reshape(1, v_pad)

    tile_m = min(tile_m, max(8, pl.cdiv(n, 8) * 8))
    n_pad = pl.cdiv(n, tile_m) * tile_m
    ids2d = ids_flat.astype(jnp.int32).reshape(n, 1)
    if n_pad != n:
        ids2d = jnp.pad(ids2d, ((0, n_pad - n), (0, 0)))  # pad id 0 -> valid row

    grid = (n_pad // tile_m,)
    kernel = functools.partial(
        _onehot_kernel, v_tile=v_tile, n_vtiles=n_vtiles, scale=scale
    )
    cost = pl.CostEstimate(
        flops=2 * n_pad * v_pad * d_model,
        transcendentals=0,
        bytes_accessed=v_pad * d_model * w.dtype.itemsize
        + n_pad * 4
        + n_pad * d_model * 4,
    )

    out = pl.pallas_call(
        kernel,
        out_shape=jax.ShapeDtypeStruct((n_pad, d_model), jnp.float32),
        grid_spec=pltpu.PrefetchScalarGridSpec(
            num_scalar_prefetch=0,
            grid=grid,
            in_specs=[
                # Per-step ids tile: tiny, fully hidden by the pipeline.
                pl.BlockSpec((tile_m, 1), lambda i: (i, 0)),
                # Resident vocab iota + table (constant index_map, 1-buffered).
                _resident_spec((1, v_pad)),
                _resident_spec((v_pad, d_model)),
            ],
            out_specs=pl.BlockSpec((tile_m, d_model), lambda i: (i, 0)),
        ),
        compiler_params=pltpu.CompilerParams(
            dimension_semantics=("parallel",),
            vmem_limit_bytes=32 * 1024 * 1024,
        ),
        cost_estimate=cost,
    )(ids2d, iota, w)
    return out[:n]


# ----------------------------------------------------------------------------
# Path B: scalar-prefetch + manual double-buffered DMA gather (any vocab size)
# ----------------------------------------------------------------------------
def _gather_kernel(ids_ref, w_hbm, o_ref, buf, sems, *,
                   rows_per_step, steps_per_core, chunk, scale):
    # ids_ref: (n_pad,) int32 in SMEM (scalar prefetch)
    # w_hbm:   (V, D) table left in HBM (memory_space=pl.ANY)
    # o_ref:   (rows_per_step, D) f32 output tile (VMEM, auto-pipelined)
    # buf:     (2, rows_per_step, D) VMEM double buffer
    # sems:    (2, rows_per_step) DMA semaphores
    core = pl.program_id(0)            # "parallel" core-split axis (2-way on v7x)
    i = pl.program_id(1)               # sequential step within this core's range
    slot = i % 2
    step = core * steps_per_core + i

    def row_copy(step_, r, slot_):
        row = ids_ref[step_ * rows_per_step + r]
        return pltpu.make_async_copy(
            w_hbm.at[pl.ds(row, 1)],               # (1, D) row in HBM
            buf.at[slot_, pl.ds(r, 1)],            # (1, D) row slot in VMEM
            sems.at[slot_, r],
        )

    def start_fetch(step_, slot_):
        for r in range(rows_per_step):             # static unroll
            row_copy(step_, r, slot_).start()

    # Prime the pipeline at the start of this core's range.
    @pl.when(i == 0)
    def _():
        start_fetch(step, slot)                    # slot == 0 here

    # Prefetch the next step's rows into the other slot while this one is consumed.
    @pl.when(i + 1 < steps_per_core)
    def _():
        start_fetch(step + 1, 1 - slot)

    # Consume this step: wait a chunk of rows, then immediately scale + store it,
    # so tail DMA latency hides behind the scale/store of earlier chunks.
    bslot = buf.at[slot]
    for c0 in range(0, rows_per_step, chunk):
        for r in range(c0, c0 + chunk):
            row_copy(step, r, slot).wait()         # identical descriptor to the start
        rows = bslot[c0:c0 + chunk, :]
        o_ref[c0:c0 + chunk, :] = (rows.astype(jnp.float32) * scale).astype(o_ref.dtype)


def _token_embedding_gather(ids_flat, weights, *, scale, rows_per_step=64,
                            chunk=8, num_splits=2):
    n = ids_flat.shape[0]
    vocab, d_model = weights.shape
    assert rows_per_step % chunk == 0

    ids = ids_flat.astype(jnp.int32)               # already clamped by the caller
    span = rows_per_step * num_splits
    n_pad = pl.cdiv(n, span) * span
    if n_pad != n:
        ids = jnp.pad(ids, (0, n_pad - n))         # pad id 0 -> valid row
    steps_per_core = n_pad // span
    grid = (num_splits, steps_per_core)

    kernel = functools.partial(
        _gather_kernel, rows_per_step=rows_per_step,
        steps_per_core=steps_per_core, chunk=chunk, scale=scale,
    )
    cost = pl.CostEstimate(
        flops=n_pad * d_model,
        transcendentals=0,
        bytes_accessed=n_pad * d_model * (weights.dtype.itemsize + 4) + n_pad * 4,
    )

    out = pl.pallas_call(
        kernel,
        out_shape=jax.ShapeDtypeStruct((n_pad, d_model), jnp.float32),
        grid_spec=pltpu.PrefetchScalarGridSpec(
            num_scalar_prefetch=1,                 # ids -> SMEM
            grid=grid,
            in_specs=[pl.BlockSpec(memory_space=pl.ANY)],   # table stays in HBM
            out_specs=pl.BlockSpec(
                (rows_per_step, d_model),
                lambda c, i, ids: (c * steps_per_core + i, 0),
            ),
            scratch_shapes=[
                pltpu.VMEM((2, rows_per_step, d_model), weights.dtype),
                pltpu.SemaphoreType.DMA((2, rows_per_step)),
            ],
        ),
        compiler_params=pltpu.CompilerParams(
            # Outer axis shards disjoint token ranges across TensorCores (v7x);
            # inner axis carries the double-buffer state and stays sequential.
            dimension_semantics=("parallel", "arbitrary"),
            vmem_limit_bytes=32 * 1024 * 1024,
        ),
        cost_estimate=cost,
    )(ids, weights)
    return out[:n]


# ----------------------------------------------------------------------------
# Public wrapper
# ----------------------------------------------------------------------------
def token_embedding(token_ids, weights, *, method="auto", tile_m=256,
                    rows_per_step=64, use_bf16=False):
    """token_ids: int (batch, seq_len); weights: (vocab, d_model).
    Returns f32 (batch, seq_len, d_model) == weights[token_ids] * sqrt(d_model)."""
    batch, seq_len = token_ids.shape
    vocab_size, d_model = weights.shape
    scale = math.sqrt(d_model)
    n = batch * seq_len

    # Clamp ids in BOTH paths so behavior is consistent (torch.nn.Embedding
    # would raise on out-of-range ids; OOB DMAs are not runtime-checked on TPU).
    ids_flat = jnp.clip(token_ids.reshape(n).astype(jnp.int32), 0, vocab_size - 1)

    w = weights.astype(jnp.bfloat16) if use_bf16 else weights

    if method == "auto":
        # One-hot/MXU path only when the table comfortably fits VMEM resident
        # (single-buffered). v5e's MXU is ~4.7x weaker than v6e/v7x, so its
        # one-hot FLOP blow-up pays off only for smaller vocabs.
        vocab_gate = 1024 if _is_v5e() else 2048
        table_bytes = vocab_size * d_model * w.dtype.itemsize
        method = (
            "onehot"
            if (vocab_size <= vocab_gate and table_bytes <= (8 << 20))
            else "gather"
        )

    if method == "onehot":
        out = _token_embedding_onehot(ids_flat, w, scale=scale, tile_m=tile_m)
    else:
        out = _token_embedding_gather(
            ids_flat, w, scale=scale, rows_per_step=rows_per_step
        )
    return out.reshape(batch, seq_len, d_model)


def make_embedding_weights(key, vocab_size, d_model):
    """Xavier-uniform init matching the PyTorch module:
    U(-limit, limit), limit = sqrt(6 / (vocab_size + d_model))."""
    limit = math.sqrt(6.0 / (vocab_size + d_model))
    u = jax.random.uniform(key, (vocab_size, d_model), dtype=jnp.float32)
    return (u * 2.0 - 1.0) * limit


if __name__ == "__main__":
    key = jax.random.PRNGKey(0)
    k_w, k_ids, k_w2, k_ids2 = jax.random.split(key, 4)

    # Small shapes consistent with the module.
    vocab_size, d_model, batch, seq_len = 64, 128, 2, 8
    weights = make_embedding_weights(k_w, vocab_size, d_model)
    token_ids = jax.random.randint(
        k_ids, (batch, seq_len), minval=0, maxval=vocab_size, dtype=jnp.int32
    )

    scale = math.sqrt(d_model)
    ref = weights[token_ids] * scale

    # Path A (auto -> one-hot/MXU, f32 table for parity with the module).
    out_a = jax.block_until_ready(token_embedding(token_ids, weights))
    assert out_a.shape == (batch, seq_len, d_model)
    assert jnp.allclose(out_a, ref, atol=2e-2, rtol=2e-2), "onehot path mismatch"

    # Path B (scalar-prefetch DMA gather; exact f32 copy + scale).
    out_b = jax.block_until_ready(token_embedding(token_ids, weights, method="gather"))
    assert jnp.allclose(out_b, ref, atol=1e-5, rtol=1e-5), "gather path mismatch"

    # Opt-in bf16 table on Path A (precision/perf tradeoff flag).
    ref_bf16 = weights.astype(jnp.bfloat16).astype(jnp.float32)[token_ids] * scale
    out_c = jax.block_until_ready(
        token_embedding(token_ids, weights, method="onehot", use_bf16=True)
    )
    assert jnp.allclose(out_c, ref_bf16, atol=1e-4, rtol=1e-4), "onehot bf16 mismatch"

    # Larger vocab + non-multiple token count: exercises vocab tiling (onehot)
    # and padding + data-dependent DMAs + the 2-way core split (gather).
    vocab2, d2, b2, s2 = 2048, 256, 2, 37
    weights2 = make_embedding_weights(k_w2, vocab2, d2)
    ids2 = jax.random.randint(k_ids2, (b2, s2), minval=0, maxval=vocab2, dtype=jnp.int32)
    ref2 = weights2[ids2] * math.sqrt(d2)

    out_d = jax.block_until_ready(token_embedding(ids2, weights2, method="gather"))
    assert out_d.shape == (b2, s2, d2)
    assert jnp.allclose(out_d, ref2, atol=1e-5, rtol=1e-5), "large gather mismatch"

    out_e = jax.block_until_ready(token_embedding(ids2, weights2, method="onehot"))
    assert jnp.allclose(out_e, ref2, atol=2e-2, rtol=2e-2), "tiled onehot mismatch"

    print("KERNEL_OK")
</pallas_src>

<mosaic_0001>
module attributes {stable_mosaic.version = 11 : i64} {
  func.func @_onehot_kernel(%arg0: i32, %arg1: memref<16x1xi32, #tpu.memory_space<vmem>>, %arg2: memref<1x128xi32, #tpu.memory_space<vmem>>, %arg3: memref<128x128xf32, #tpu.memory_space<vmem>>, %arg4: memref<16x128xf32, #tpu.memory_space<vmem>>) attributes {dimension_semantics = [#tpu.dimension_semantics<parallel>], iteration_bounds = array<i64: 1>, scalar_prefetch = 0 : i64, scratch_operands = 0 : i64, tpu.core_type = #tpu.core_type<tc>, window_params = [{transform_indices = @transform_0, window_bounds = array<i64: 16, 1>}, {pipeline_mode = #tpu.pipeline_mode<synchronous>, transform_indices = @transform_1, window_bounds = array<i64: 1, 128>}, {pipeline_mode = #tpu.pipeline_mode<synchronous>, transform_indices = @transform_2, window_bounds = array<i64: 128, 128>}, {transform_indices = @transform_3, window_bounds = array<i64: 16, 128>}]} {
    %c0 = arith.constant 0 : index
    %c0_0 = arith.constant 0 : index
    %0 = vector.load %arg1[%c0, %c0_0] : memref<16x1xi32, #tpu.memory_space<vmem>>, vector<16x1xi32>
    %cst = arith.constant 0.000000e+00 : f32
    %1 = vector.broadcast %cst : f32 to vector<16x128xf32>
    %c0_1 = arith.constant 0 : index
    %c0_2 = arith.constant 0 : index
    %2 = vector.load %arg2[%c0_1, %c0_2] : memref<1x128xi32, #tpu.memory_space<vmem>>, vector<1x128xi32>
    %3 = vector.broadcast %0 : vector<16x1xi32> to vector<16x128xi32>
    %4 = vector.broadcast %2 : vector<1x128xi32> to vector<16x128xi32>
    %5 = arith.cmpi eq, %3, %4 : vector<16x128xi32>
    %6 = arith.extui %5 : vector<16x128xi1> to vector<16x128xi32>
    %7 = arith.sitofp %6 : vector<16x128xi32> to vector<16x128xf32>
    %c0_3 = arith.constant 0 : index
    %c0_4 = arith.constant 0 : index
    %8 = vector.load %arg3[%c0_3, %c0_4] : memref<128x128xf32, #tpu.memory_space<vmem>>, vector<128x128xf32>
    %cst_5 = arith.constant dense<0.000000e+00> : vector<16x128xf32>
    %9 = tpu.matmul %7, %8, %cst_5 {dimension_numbers = #tpu.dot_dimension_numbers<[1], [0], [0], [1], [0, 0, 1, 1], [], []>, precision = #tpu.contract_precision<fp32>} : vector<16x128xf32>, vector<128x128xf32>, vector<16x128xf32> -> vector<16x128xf32>
    %10 = arith.addf %1, %9 : vector<16x128xf32>
    %cst_6 = arith.constant 11.3137083 : f32
    %11 = vector.broadcast %cst_6 : f32 to vector<16x128xf32>
    %12 = arith.mulf %10, %11 : vector<16x128xf32>
    %c0_7 = arith.constant 0 : index
    %c0_8 = arith.constant 0 : index
    %13 = vector.load %arg4[%c0_7, %c0_8] : memref<16x128xf32, #tpu.memory_space<vmem>>, vector<16x128xf32>
    tpu.vector_store %arg4[%c0_7, %c0_8], %12 {strides = array<i32>} : memref<16x128xf32, #tpu.memory_space<vmem>>, vector<16x128xf32>,
    return
  }
  func.func @transform_0(%arg0: i32) -> (i32, i32) {
    %c0_i32 = arith.constant 0 : i32
    %c0_i32_0 = arith.constant 0 : i32
    return %arg0, %c0_i32 : i32, i32
  }
  func.func @transform_1(%arg0: i32) -> (i32, i32) {
    %c0_i32 = arith.constant 0 : i32
    %c0_i32_0 = arith.constant 0 : i32
    %c0_i32_1 = arith.constant 0 : i32
    return %c0_i32, %c0_i32_0 : i32, i32
  }
  func.func @transform_2(%arg0: i32) -> (i32, i32) {
    %c0_i32 = arith.constant 0 : i32
    %c0_i32_0 = arith.constant 0 : i32
    %c0_i32_1 = arith.constant 0 : i32
    return %c0_i32, %c0_i32_0 : i32, i32
  }
  func.func @transform_3(%arg0: i32) -> (i32, i32) {
    %c0_i32 = arith.constant 0 : i32
    %c0_i32_0 = arith.constant 0 : i32
    return %arg0, %c0_i32 : i32, i32
  }
}

</mosaic_0001>

<bundles_post_ra>
// kernel: tpu_custom_call.1
= control target key start
LH: loop header
LB: loop body
LE: loop exit
PB: predicated region body
PF: predicated region fallthrough
CT: control target
= control target key end

     0   :  { %8 = vsyncpa [#allocation3], 0  ;;  %s1676_s0 = inlined_call_operand.vmem [shape: s32[16,1], index: 0, kind: input, shape index: {}]   ;;  %s1677_s1 = inlined_call_operand.vmem [shape: s32[1,128], index: 1, kind: input, shape index: {}]   ;;  %s1678_s2 = inlined_call_operand.hbm [shape: f32[128,128], index: 2, kind: input, shape index: {}]   ;;  %s1679_s3 = inlined_call_operand.hbm [shape: f32[16,128], index: 3, kind: output, shape index: {}]  }
   0x1   :  { %9 = vsyncpa [#allocation4], 0  ;;  %s1354_s12 = smov [#allocation2]   ;;  %s1306_s16 = scalar_lea.hbm %s1678_s2, 2048 }
   0x2   :  { %s19_s13 = sshll.u32 %s1354_s12, 4  ;;  %p1307_p0 = scmp.ne.s32.totalorder %s1678_s2, %s1306_s16  ;;  %s20_s13 = int_to_ptr.vmem [resolvable:$true] %s19_s13 }
   0x3   :  { %p1310_p1 = scmp.lt.u32.totalorder %s1306_s16, %s1678_s2 }
   0x5   :  { %p1312_p2 = pnand %p1310_p1, %p1307_p0 }
   0x7   :  { %1315 = shalt.err (!%p1312_p2)
}
   0x8   :  { %s1316_s21 = scalar_lea.vmem %s20_s13, 2048  ;;  %p1321_p4 = scmp.lt.s32.totalorder %s20_s13, %s20_s13 }
   0x9   :  { %p1317_p3 = scmp.ne.s32.totalorder %s20_s13, %s1316_s21  ;;  %p1322_p5 = scmp.lt.s32.totalorder %s1316_s21, %s1316_s21 }
   0xb   :  { %p1323_p6 = por %p1322_p5, %p1321_p4 }
   0xd   :  { %p1324_p7 = pnand %p1323_p6, %p1317_p3 }
   0xf   :  { %1327 = shalt.err (!%p1324_p7)
}
  0x10   :  { %s1355_s22 = smov 128   ;;  %s1356_s23 = smov 8  }
  0x11   :  { %25 = dma.hbm_to_vmem [thread:$0]  %s1678_s2, 2048, %s20_s13, [#allocation3], %s1355_s22, %s1355_s22, %s1356_s23  }
  0x12   :  { %1350 = dma.done.wait [#allocation3], 2048  }
  0x13   :  { %1351 = vsyncadd [#allocation3], 4294965248  ;;  %v1357_v0 = vmov 0   ;;  %v29_v1 = vld [vmem:[%s1676_s0] sm:$0xff]  ;;  %v48_v2 = vld [vmem:[#allocation2] sm:$0xff] }
  0x14   :  { %1305 = vset.pattern.permute.xlu0 %v1357_v0  ;;  %v49_v3 = vld [vmem:[#allocation2 + $0x8] sm:$0xff]  ;;  %v65_v4 = vand.u32 4294901760, %v48_v2  ;;  %v50_v5 = vld [vmem:[#allocation2 + $0x10] sm:$0xff]  ;;  %v51_v6 = vld [vmem:[#allocation2 + $0x18] sm:$0xff] }
  0x15   :  { %33 = vperm.xlu0 %1305, %v29_v1   ;;  %v30_v7 = vld [vmem:[%s1676_s0 + $0x8] sm:$0xff]  ;;  %v68_v8 = vand.u32 4294901760, %v49_v3  ;;  %v71_v9 = vand.u32 4294901760, %v50_v5  ;;  %v74_v10 = vand.u32 4294901760, %v51_v6  ;;  %v52_v11 = vld [vmem:[#allocation2 + $0x20] sm:$0xff]  ;;  %v53_v12 = vld [vmem:[#allocation2 + $0x28] sm:$0xff] }
  0x16   :  { %v77_v15 = vand.u32 4294901760, %v52_v11  ;;  %v80_v16 = vand.u32 4294901760, %v53_v12  ;;  %v54_v17 = vld [vmem:[#allocation2 + $0x30] sm:$0xff]  ;;  %v55_v18 = vld [vmem:[#allocation2 + $0x38] sm:$0xff]  ;;  %v56_v22 = vld [vmem:[#allocation2 + $0x40] sm:$0xff]  ;;  %v1450_v45 = vsub.f32 %v48_v2, %v65_v4 }
  0x17   :  { %v1402_v13 = vpack.c.bf16 %v68_v8, %v65_v4  ;;  %v1404_v14 = vpack.c.bf16 %v74_v10, %v71_v9  ;;  %v83_v20 = vand.u32 4294901760, %v54_v17  ;;  %v86_v21 = vand.u32 4294901760, %v55_v18  ;;  %v57_v23 = vld [vmem:[#allocation2 + $0x48] sm:$0xff]  ;;  %v1420_v28 = vld [vmem:[#allocation2 + $0x50] sm:$0xff]  ;;  %v1428_v32 = vld [vmem:[#allocation2 + $0x58] sm:$0xff] }
  0x18   :  { %v1412_v19 = vpack.c.bf16 %v80_v16, %v77_v15  ;;  %v1414_v24 = vsub.f32 %v50_v5, %v71_v9  ;;  %v1416_v25 = vsub.f32 %v51_v6, %v74_v10  ;;  %v89_v26 = vand.u32 4294901760, %v56_v22  ;;  %v1444_v41 = vld [vmem:[#allocation2 + $0x60] sm:$0xff]  ;;  %v1448_v44 = vld [vmem:[#allocation2 + $0x68] sm:$0xff]  ;;  %v1472_v58 = vld [vmem:[#allocation2 + $0x70] sm:$0xff] }
  0x19   :  { %36 = vperm.xlu0 %1305, %v30_v7   ;;  %1193 = vmatprep.subr.bf16.mxu0 %v1402_v13  ;;  %v92_v27 = vand.u32 4294901760, %v57_v23  ;;  %v1426_v31 = vpack.c.bf16 %v86_v21, %v83_v20  ;;  %v95_v36 = vand.u32 4294901760, %v1420_v28  ;;  %v1435_v37 = vsub.f32 %v52_v11, %v77_v15  ;;  %v63_v61 = vld [vmem:[#allocation2 + $0x78] sm:$0xff] }
  0x1a   :  { %1097 = vmatprep.subr.bf16.mxu1 %v1402_v13  ;;  %1195 = vmatpush3.bf16.msra.mxu0 %v1402_v13  ;;  %v182_v29 = vand.u32 4294901760, %v1414_v24  ;;  %v189_v30 = vand.u32 4294901760, %v1416_v25  ;;  %v1437_v38 = vsub.f32 %v53_v12, %v80_v16  ;;  %v98_v40 = vand.u32 4294901760, %v1428_v32 }
  0x1b   :  { %1099 = vmatpush3.bf16.msra.mxu1 %v1402_v13  ;;  %1197 = vmatprep.subr.bf16.mxu0 %v1404_v14  ;;  %v1441_v39 = vpack.c.bf16 %v92_v27, %v89_v26  ;;  %v1452_v46 = vsub.f32 %v49_v3, %v68_v8  ;;  %v196_v47 = vand.u32 4294901760, %v1435_v37  ;;  %v1458_v50 = vsub.f32 %v54_v17, %v83_v20 }
  0x1c   :  { %1101 = vmatprep.subr.bf16.mxu1 %v1404_v14  ;;  %v1430_v33 = vpack.c.bf16 %v189_v30, %v182_v29  ;;  %v183_v34 = vsub.f32 %v1414_v24, %v182_v29  ;;  %v190_v35 = vsub.f32 %v1416_v25, %v189_v30  ;;  %v203_v48 = vand.u32 4294901760, %v1437_v38 }
  0x1d   :  { %v1460_v51 = vsub.f32 %v55_v18, %v86_v21  ;;  %v101_v52 = vand.u32 4294901760, %v1444_v41  ;;  %v197_v54 = vsub.f32 %v1435_v37, %v196_v47  ;;  %v1469_v56 = vpack.c.bf16 %v98_v40, %v95_v36 }
  0x1e   :  { %1199 = vmatpush3.bf16.msra.mxu0 %v1404_v14  ;;  %v184_v42 = vand.u32 4294901760, %v183_v34  ;;  %v191_v43 = vand.u32 4294901760, %v190_v35  ;;  %v1463_v53 = vpack.c.bf16 %v203_v48, %v196_v47  ;;  %v204_v55 = vsub.f32 %v1437_v38, %v203_v48 }
  0x1f   :  { %1103 = vmatpush3.bf16.msra.mxu1 %v1404_v14  ;;  %1201 = vmatprep.subr.bf16.mxu0 %v1412_v19  ;;  %v104_v57 = vand.u32 4294901760, %v1448_v44  ;;  %v210_v59 = vand.u32 4294901760, %v1458_v50  ;;  %v217_v60 = vand.u32 4294901760, %v1460_v51  ;;  %v168_v62 = vand.u32 4294901760, %v1450_v45 }
  0x20   :  { %1105 = vmatprep.subr.bf16.mxu1 %v1412_v19  ;;  %v1456_v49 = vpack.c.bf16 %v191_v43, %v184_v42  ;;  %v175_v63 = vand.u32 4294901760, %v1452_v46  ;;  %v198_v0 = vand.u32 4294901760, %v197_v54  ;;  %v205_v1 = vand.u32 4294901760, %v204_v55 }
  0x21   :  { %v1480_v2 = vpack.c.bf16 %v217_v60, %v210_v59  ;;  %v211_v3 = vsub.f32 %v1458_v50, %v210_v59  ;;  %v218_v4 = vsub.f32 %v1460_v51, %v217_v60  ;;  %v1484_v5 = vsub.f32 %v56_v22, %v89_v26 }
  0x22   :  { %1203 = vmatpush3.bf16.msra.mxu0 %v1412_v19  ;;  %v107_v6 = vand.u32 4294901760, %v1472_v58  ;;  %v1487_v7 = vpack.c.bf16 %v205_v1, %v198_v0  ;;  %v1489_v8 = vsub.f32 %v57_v23, %v92_v27  ;;  %v110_v9 = vand.u32 4294901760, %v63_v61 }
  0x23   :  { %1107 = vmatpush3.bf16.msra.mxu1 %v1412_v19  ;;  %1205 = vmatprep.subr.bf16.mxu0 %v1426_v31  ;;  %v212_v10 = vand.u32 4294901760, %v211_v3  ;;  %v219_v11 = vand.u32 4294901760, %v218_v4  ;;  %v224_v12 = vand.u32 4294901760, %v1484_v5  ;;  %v1496_v15 = vpack.c.bf16 %v104_v57, %v101_v52 }
  0x24   :  { %1109 = vmatprep.subr.bf16.mxu1 %v1426_v31  ;;  %v169_v16 = vsub.f32 %v1450_v45, %v168_v62  ;;  %v176_v17 = vsub.f32 %v1452_v46, %v175_v63  ;;  %v231_v18 = vand.u32 4294901760, %v1489_v8  ;;  %v237_v22 = vsub.f32 %v1420_v28, %v95_v36 }
  0x25   :  { %v1501_v20 = vpack.c.bf16 %v219_v11, %v212_v10  ;;  %v225_v21 = vsub.f32 %v1484_v5, %v224_v12  ;;  %v244_v23 = vsub.f32 %v1428_v32, %v98_v40  ;;  %v1513_v35 = vpack.c.bf16 %v110_v9, %v107_v6 }
  0x26   :  { %1207 = vmatpush3.bf16.msra.mxu0 %v1426_v31  ;;  %v1506_v26 = vpack.c.bf16 %v231_v18, %v224_v12  ;;  %v232_v27 = vsub.f32 %v1489_v8, %v231_v18  ;;  %v238_v30 = vand.u32 4294901760, %v237_v22  ;;  %v170_v28 = vand.u32 4294901760, %v169_v16 }
  0x27   :  { %1111 = vmatpush3.bf16.msra.mxu1 %v1426_v31  ;;  %1209 = vmatprep.subr.bf16.mxu0 %v1441_v39  ;;  %v226_v29 = vand.u32 4294901760, %v225_v21  ;;  %v245_v34 = vand.u32 4294901760, %v244_v23  ;;  %v177_v36 = vand.u32 4294901760, %v176_v17  ;;  %v251_v47 = vsub.f32 %v1444_v41, %v101_v52 }
  0x28   :  { %1113 = vmatprep.subr.bf16.mxu1 %v1441_v39  ;;  %v233_v32 = vand.u32 4294901760, %v232_v27  ;;  %v239_v42 = vsub.f32 %v237_v22, %v238_v30  ;;  %v258_v54 = vsub.f32 %v1448_v44, %v104_v57  ;;  %v1224_v0 = vpack.c.bf16 %v175_v63, %v168_v62 }
  0x29   :  { %v1515_v40 = vpack.c.bf16 %v245_v34, %v238_v30  ;;  %v246_v43 = vsub.f32 %v244_v23, %v245_v34  ;;  %v252_v60 = vand.u32 4294901760, %v251_v47  ;;  %v1128_v1 = vpack.c.bf16 %v177_v36, %v170_v28 }
  0x2a   :  { %1211 = vmatpush3.bf16.msra.mxu0 %v1441_v39  ;;  %v1518_v48 = vpack.c.bf16 %v233_v32, %v226_v29  ;;  %v240_v55 = vand.u32 4294901760, %v239_v42  ;;  %v259_v3 = vand.u32 4294901760, %v258_v54  ;;  %v265_v52 = vsub.f32 %v1472_v58, %v107_v6 }
  0x2b   :  { %1115 = vmatpush3.bf16.msra.mxu1 %v1441_v39  ;;  %1213 = vmatprep.subr.bf16.mxu0 %v1469_v56  ;;  %v247_v59 = vand.u32 4294901760, %v246_v43  ;;  %v253_v41 = vsub.f32 %v251_v47, %v252_v60  ;;  %v272_v44 = vsub.f32 %v63_v61, %v110_v9  ;;  %v1538_v9 = vpack.c.bf16 %v1452_v46, %v1450_v45 }
  0x2c   :  { %1117 = vmatprep.subr.bf16.mxu1 %v1469_v56  ;;  %v1528_v57 = vpack.c.bf16 %v259_v3, %v252_v60  ;;  %v260_v10 = vsub.f32 %v258_v54, %v259_v3  ;;  %v266_v12 = vand.u32 4294901760, %v265_v52  ;;  %v1542_v27 = vpack.c.bf16 %v1416_v25, %v1414_v24  ;;  %v1565_v24 = vld [vmem:[%s1677_s1] ss:$0 sm:$0xff]  ;;  %s1360_s1 = smov [#allocation5]  }
  0x2d   :  { %v1525_v4 = vpack.c.bf16 %v247_v59, %v240_v55  ;;  %v254_v11 = vand.u32 4294901760, %v253_v41  ;;  %v273_v16 = vand.u32 4294901760, %v272_v44  ;;  %v1546_v29 = vpack.c.bf16 %v1437_v38, %v1435_v37  ;;  %s757_s30 = sshll.u32 %s1360_s1, 4  ;;  %s758_s30 = int_to_ptr.vmem [resolvable:$true] %s757_s30 }
  0x2e   :  { %1215 = vmatpush3.bf16.msra.mxu0 %v1469_v56  ;;  %v261_v62 = vand.u32 4294901760, %v260_v10  ;;  %v267_v17 = vsub.f32 %v265_v52, %v266_v12  ;;  %v1550_v30 = vpack.c.bf16 %v1460_v51, %v1458_v50  ;;  %v1554_v34 = vpack.c.bf16 %v1489_v8, %v1484_v5  ;;  %s1328_s4 = scalar_lea.vmem %s758_s30, 256  ;;  %p1333_p9 = scmp.lt.s32.totalorder %s758_s30, %s758_s30 }
  0x2f   :  { %1119 = vmatpush3.bf16.msra.mxu1 %v1469_v56  ;;  %1217 = vmatprep.subr.bf16.mxu0 %v1496_v15  ;;  %v1532_v63 = vpack.c.bf16 %v273_v16, %v266_v12  ;;  %v274_v18 = vsub.f32 %v272_v44, %v273_v16  ;;  %v1556_v28 = vpack.c.bf16 %v244_v23, %v237_v22  ;;  %v1358_v37 = vmov 0.0   ;;  %p1329_p8 = scmp.ne.s32.totalorder %s758_s30, %s1328_s4  ;;  %p1334_p10 = scmp.lt.s32.totalorder %s1328_s4, %s1328_s4 }
  0x30   :  { %1121 = vmatprep.subr.bf16.mxu1 %v1496_v15  ;;  %v1152_v21 = vpack.c.bf16 %v261_v62, %v254_v11  ;;  %v268_v58 = vand.u32 4294901760, %v267_v17  ;;  %v1558_v45 = vpack.c.bf16 %v258_v54, %v251_v47  ;;  %v1560_v46 = vpack.c.bf16 %v272_v44, %v265_v52 }
  0x31   :  { %v275_v61 = vand.u32 4294901760, %v274_v18  ;;  %v1359_v43 = vmov 1.0   ;;  %p1335_p11 = por %p1334_p10, %p1333_p9 }
  0x32   :  { %1219 = vmatpush3.bf16.msra.mxu0 %v1496_v15 }
  0x33   :  { %1123 = vmatpush3.bf16.msra.mxu1 %v1496_v15  ;;  %1221 = vmatprep.subr.bf16.mxu0 %v1513_v35  ;;  %v1534_v6 = vpack.c.bf16 %v275_v61, %v268_v58  ;;  %p1336_p12 = pnand %p1335_p11, %p1329_p8 }
  0x34   :  { %1125 = vmatprep.subr.bf16.mxu1 %v1513_v35 }
  0x36   :  { %1223 = vmatpush3.bf16.msra.mxu0 %v1513_v35 }
  0x37   :  { %1127 = vmatpush3.bf16.msra.mxu1 %v1513_v35  ;;  %1225 = vmatprep.subr.bf16.mxu0 %v1224_v0 }
  0x38   :  { %1129 = vmatprep.subr.bf16.mxu1 %v1128_v1 }
  0x94   :  { %v34_v25 = vpop.permute.xlu0 %33 }
  0x95   :  { %vm42_vm0 = vcmp.eq.s32.totalorder %v34_v25, %v1565_v24 }
  0x96   :  { %v770_v38 = vsel %vm42_vm0, 1.0, %v1358_v37 }
  0x97   :  { %v146_v50 = vsub.f32 %v770_v38, %v770_v38 }
  0x98   :  { %v1570_v51 = vpop.permute.xlu0 %36 }
  0x99   :  { %vm43_vm1 = vcmp.eq.s32.totalorder %v1570_v51, %v1565_v24  ;;  %v147_v5 = vand.u32 4294901760, %v146_v50 }
  0x9a   :  { %v771_v8 = vsel %vm43_vm1, 1.0, %v1358_v37 }
  0x9b   :  { %v1577_v22 = vsub.f32 %v771_v8, %v771_v8  ;;  %1023 = vmatprep.mubr.f32.mxu0 %v147_v5  ;;  %v148_v23 = vsub.f32 %v146_v50, %v147_v5 }
  0x9d   :  { %v149_v36 = vand.u32 4294901760, %v148_v23  ;;  %v157_v32 = vand.u32 4294901760, %v1577_v22 }
  0x9f   :  { %918 = vmatprep.mubr.f32.mxu1 %v149_v36  ;;  %1024 = vmatmul.mubr.f32.vlgmr.msra.gmra.mrb[0].mxu0 %v157_v32  ;;  %v158_v42 = vsub.f32 %v1577_v22, %v157_v32 }
  0xa0   :  { %1227 = vmatpush3.bf16.msra.mxu0 %v1224_v0  ;;  %1058 = vmatprep.mubr.msk.f32.mxu0 %vm42_vm0, %v1359_v43 }
  0xa1   :  { %1229 = vmatprep.subr.bf16.mxu0 %v1430_v33  ;;  %v159_v47 = vand.u32 4294901760, %v158_v42 }
  0xa3   :  { %919 = vmatmul.mubr.f32.vlgmr.msra.gmra.mrb[0].mxu1 %v159_v47 }
  0xa4   :  { %1131 = vmatpush3.bf16.msra.mxu1 %v1128_v1  ;;  %1231 = vmatpush3.bf16.msra.mxu0 %v1430_v33 }
  0xa5   :  { %953 = vmatprep.mubr.msk.f32.mxu1 %vm42_vm0, %v1359_v43  ;;  %1133 = vmatprep.subr.bf16.mxu1 %v1456_v49 }
  0xa6   :  { %1233 = vmatprep.subr.bf16.mxu0 %v1463_v53 }
  0xa8   :  { %1135 = vmatpush3.bf16.msra.mxu1 %v1456_v49  ;;  %1235 = vmatpush3.bf16.msra.mxu0 %v1463_v53 }
  0xa9   :  { %1137 = vmatprep.subr.bf16.mxu1 %v1487_v7  ;;  %1237 = vmatprep.subr.bf16.mxu0 %v1480_v2 }
  0xac   :  { %1139 = vmatpush3.bf16.msra.mxu1 %v1487_v7  ;;  %1239 = vmatpush3.bf16.msra.mxu0 %v1480_v2 }
  0xad   :  { %1141 = vmatprep.subr.bf16.mxu1 %v1501_v20  ;;  %1241 = vmatprep.subr.bf16.mxu0 %v1506_v26 }
  0xb0   :  { %1143 = vmatpush3.bf16.msra.mxu1 %v1501_v20  ;;  %1243 = vmatpush3.bf16.msra.mxu0 %v1506_v26 }
  0xb1   :  { %1145 = vmatprep.subr.bf16.mxu1 %v1518_v48  ;;  %1245 = vmatprep.subr.bf16.mxu0 %v1515_v40 }
  0xb4   :  { %1147 = vmatpush3.bf16.msra.mxu1 %v1518_v48  ;;  %1247 = vmatpush3.bf16.msra.mxu0 %v1515_v40 }
  0xb5   :  { %1149 = vmatprep.subr.bf16.mxu1 %v1525_v4  ;;  %1249 = vmatprep.subr.bf16.mxu0 %v1528_v57 }
  0xb8   :  { %1151 = vmatpush3.bf16.msra.mxu1 %v1525_v4  ;;  %1251 = vmatpush3.bf16.msra.mxu0 %v1528_v57 }
  0xb9   :  { %1153 = vmatprep.subr.bf16.mxu1 %v1152_v21  ;;  %1253 = vmatprep.subr.bf16.mxu0 %v1532_v63 }
  0xbc   :  { %1155 = vmatpush3.bf16.msra.mxu1 %v1152_v21  ;;  %1255 = vmatpush3.bf16.msra.mxu0 %v1532_v63 }
  0xbd   :  { %1157 = vmatprep.subr.bf16.mxu1 %v1534_v6  ;;  %1257 = vmatprep.subr.bf16.mxu0 %v1402_v13 }
  0xbf   :  { %1059 = vmatmul.mubr.msk.f32.vlgmr.msra.gmra.mrb[0].mxu0 %vm43_vm1, %v1359_v43 }
  0xc0   :  { %1159 = vmatpush3.bf16.msra.mxu1 %v1534_v6  ;;  %1259 = vmatpush3.bf16.msra.mxu0 %v1402_v13 }
  0xc1   :  { %1093 = vmatprep.mubr.msk.f32.mxu0 %vm42_vm0, %v1359_v43  ;;  %1161 = vmatprep.subr.bf16.mxu1 %v1538_v9 }
  0xc2   :  { %1261 = vmatprep.subr.bf16.mxu0 %v1404_v14 }
  0xc3   :  { %954 = vmatmul.mubr.msk.f32.vlgmr.msra.gmra.mrb[0].mxu1 %vm43_vm1, %v1359_v43 }
  0xc4   :  { %1163 = vmatpush3.bf16.msra.mxu1 %v1538_v9  ;;  %988 = vmatprep.mubr.f32.mxu1 %v146_v50 }
  0xc5   :  { %1263 = vmatpush3.bf16.msra.mxu0 %v1404_v14  ;;  %1165 = vmatprep.subr.bf16.mxu1 %v1542_v27 }
  0xc6   :  { %1265 = vmatprep.subr.bf16.mxu0 %v1412_v19 }
  0xc8   :  { %1167 = vmatpush3.bf16.msra.mxu1 %v1542_v27 }
  0xc9   :  { %1267 = vmatpush3.bf16.msra.mxu0 %v1412_v19  ;;  %1169 = vmatprep.subr.bf16.mxu1 %v1546_v29 }
  0xca   :  { %1269 = vmatprep.subr.bf16.mxu0 %v1426_v31 }
  0xcc   :  { %1171 = vmatpush3.bf16.msra.mxu1 %v1546_v29 }
  0xcd   :  { %1271 = vmatpush3.bf16.msra.mxu0 %v1426_v31  ;;  %1173 = vmatprep.subr.bf16.mxu1 %v1550_v30 }
  0xce   :  { %1273 = vmatprep.subr.bf16.mxu0 %v1441_v39 }
  0xd0   :  { %1175 = vmatpush3.bf16.msra.mxu1 %v1550_v30 }
  0xd1   :  { %1275 = vmatpush3.bf16.msra.mxu0 %v1441_v39  ;;  %1177 = vmatprep.subr.bf16.mxu1 %v1554_v34 }
  0xd2   :  { %1277 = vmatprep.subr.bf16.mxu0 %v1469_v56 }
  0xd4   :  { %1179 = vmatpush3.bf16.msra.mxu1 %v1554_v34 }
  0xd5   :  { %1279 = vmatpush3.bf16.msra.mxu0 %v1469_v56  ;;  %1181 = vmatprep.subr.bf16.mxu1 %v1556_v28 }
  0xd6   :  { %1281 = vmatprep.subr.bf16.mxu0 %v1496_v15 }
  0xd8   :  { %1183 = vmatpush3.bf16.msra.mxu1 %v1556_v28 }
  0xd9   :  { %1283 = vmatpush3.bf16.msra.mxu0 %v1496_v15  ;;  %1185 = vmatprep.subr.bf16.mxu1 %v1558_v45 }
  0xda   :  { %1285 = vmatprep.subr.bf16.mxu0 %v1513_v35 }
  0xdc   :  { %1187 = vmatpush3.bf16.msra.mxu1 %v1558_v45 }
  0xdd   :  { %1287 = vmatpush3.bf16.msra.mxu0 %v1513_v35  ;;  %1189 = vmatprep.subr.bf16.mxu1 %v1560_v46 }
  0xe0   :  { %1094 = vmatmul.mubr.msk.f32.vlgmr.msra.gmra.mrb[0].mxu0 %vm43_vm1, %v1359_v43  ;;  %1191 = vmatpush3.bf16.msra.mxu1 %v1560_v46 }
  0xe3   :  { %989 = vmatmul.mubr.f32.vlgmr.msra.gmra.mrb[0].mxu1 %v1577_v22 }
 0x1b3   :  { %v1095_v13 = vpop.f32.mrb[0].mxu0 }
 0x1b4   :  { %v738_v14 = vpop.f32.mrb[1].mxu0 }
 0x1b6   :  { %v990_v19 = vpop.f32.mrb[0].mxu1 }
 0x1b7   :  { %v1288_v31 = vadd.f32 %v1095_v13, %v990_v19  ;;  %v422_v33 = vpop.f32.mrb[1].mxu1 }
 0x1b8   :  { %v1289_v39 = vadd.f32 %v738_v14, %v422_v33 }
 0x1b9   :  { %v749_v49 = vmul.f32 11.313708, %v1288_v31 }
 0x1ba   :  { %v748_v53 = vmul.f32 11.313708, %v1289_v39 }
 0x1bb   :  { %751 = vst [vmem:[#allocation5 + $0x8] sm:$0xff] %v749_v49 }
 0x1bc   :  { %750 = vst [vmem:[#allocation5] sm:$0xff] %v748_v53 }
 0x1bd   :  { %1339 = shalt.err (!%p1336_p12)
}
 0x1be   :  { %s1340_s7 = scalar_lea.hbm %s1679_s3, 256 }
 0x1bf   :  { %p1341_p13 = scmp.ne.s32.totalorder %s1679_s3, %s1340_s7  ;;  %p1344_p0 = scmp.lt.u32.totalorder %s1340_s7, %s1679_s3 }
 0x1c1   :  { %p1346_p1 = pnand %p1344_p0, %p1341_p13 }
 0x1c3   :  { %1349 = shalt.err (!%p1346_p1)
}
 0x1c4   :  { %763 = dma.vmem_to_hbm [thread:$0]  %s758_s30, 256, %s1679_s3, [#allocation4], %s1355_s22, %s1355_s22, %s1356_s23  }
 0x1c5   :  { %1352 = dma.done.wait [#allocation4], 256  }
 0x1c6   :  { %1353 = vsyncadd [#allocation4], 4294967040 }
 0x1c7   :  { %767 = vsyncpa [#allocation3], 1 }
 0x1c8   :  { %768 = vsyncpa [#allocation4], 1 }

</bundles_post_ra>
